<compile_context>
chip_gen: v5e
topology: v5e:2x2
jax: 0.10.0
libtpu: 0.0.40
codegen_flags: <defaults>
</compile_context>

<pallas_src>
import jax
import jax.numpy as jnp
from jax import lax
from jax.experimental import pallas as pl
from jax.experimental.pallas import tpu as pltpu


# --------------------------------------------------------------------------
# Fused kernel: Q projection + energy + softmax + attn @ V + residual epilogue.
# K and V are precomputed per batch in the wrapper and live in VMEM for the
# whole grid (no per-tile recomputation, no double buffering).
# --------------------------------------------------------------------------
def self_attention_kernel(gamma_ref, x_ref, xres_ref, k_ref, v_ref,
                          wq_ref, bq_ref, out_ref):
    b = pl.program_id(0)

    # Query-source tile in native (channels, pixels) layout -- no transposes.
    x_t = x_ref[0]                                                    # (C, TQ) f32

    # 1x1-conv query projection on the MXU: q^T = Wq @ x_tile + bq.
    q_t = jnp.dot(wq_ref[...], x_t.astype(jnp.bfloat16),
                  preferred_element_type=jnp.float32) + bq_ref[...]   # (C8, TQ) f32

    # energy[t, j] = sum_c8 q_t[c8, t] * k[c8, j]  (contract dim 0 of both).
    # Only the small (C8, TQ) operand plays the "transposed" role; the large
    # activation tile is never transposed.  f32 in / f32 acc (K-dim = C/8 is tiny).
    energy = lax.dot_general(q_t, k_ref[b], (((0,), (0,)), ((), ())),
                             preferred_element_type=jnp.float32)      # (TQ, n)

    # Numerically-stable softmax over the downsampled key axis (f32).
    m = jnp.max(energy, axis=-1, keepdims=True)
    p = jnp.exp(energy - m)
    attn = p * pl.reciprocal(jnp.sum(p, axis=-1, keepdims=True), approx=False)

    # out[t, c] = sum_j attn[t, j] * v[j, c]   (bf16 in / f32 acc on the MXU).
    out = jnp.dot(attn.astype(jnp.bfloat16), v_ref[b],
                  preferred_element_type=jnp.float32)                 # (TQ, C)

    # Fused residual epilogue.  xres is x's memory reinterpreted as (N, C),
    # which is exactly what torch's `out.view(B, C, H, W)` on a contiguous
    # (B, HW, C) tensor does in the reference module.
    out_ref[0] = (gamma_ref[0, 0] * out
                  + xres_ref[0].astype(jnp.float32)).astype(out_ref.dtype)


# --------------------------------------------------------------------------
# Tiling helpers (generation-aware)
# --------------------------------------------------------------------------
def _hw_tile_params(C, n):
    """Query-tile cap and scoped-VMEM limit for the current TPU generation."""
    try:
        vmem_bytes = int(pltpu.get_tpu_info().vmem_capacity_bytes)
    except Exception:
        vmem_bytes = 64 * 1024 * 1024            # conservative (v7x-sized) default
    if vmem_bytes >= 100 * 1024 * 1024:          # v5e / v6e: 128 MiB VMEM
        return 1024, 64 * 1024 * 1024
    # v7x: 64 MiB per TensorCore -- tighter tiles / scoped limit.
    cap = 256 if (C >= 1024 or n >= 2048) else 512
    return cap, 48 * 1024 * 1024


def _choose_q_block(n_pad, cap, requested=None):
    """Largest multiple-of-128 divisor of n_pad not exceeding `cap`."""
    if requested is not None:
        assert requested % 128 == 0 and n_pad % requested == 0, (
            "q_block must be a multiple of 128 dividing the (padded) pixel count")
        return requested
    best, t = 128, 128
    while t <= min(cap, n_pad):
        if n_pad % t == 0:
            best = t
        t += 128
    return best


# --------------------------------------------------------------------------
# Wrapper
# --------------------------------------------------------------------------
def self_attention_forward(x_nchw, params, downsample_factor=4, q_block=None,
                           out_dtype=jnp.float32):
    """x_nchw: (B, C, H, W) float32. Returns (B, C, H, W) in `out_dtype`."""
    B, C, H, W = x_nchw.shape
    df = downsample_factor
    assert C % 8 == 0, "in_channels must be divisible by 8 (module uses C // 8)"
    C8 = C // 8

    # adaptive_avg_pool2d with exact divisibility == df x df mean pool.
    # TODO(synk): non-divisible H/W would need true adaptive pooling windows.
    if df > 1:
        assert H % df == 0 and W % df == 0
        h, w = H // df, W // df
        x_down = x_nchw.reshape(B, C, h, df, w, df).mean(axis=(3, 5))
    else:
        h, w = H, W
        x_down = x_nchw
    n = h * w
    N = H * W

    # ---- K / V projections hoisted out of the kernel (tiny, downsampled grid).
    # 1x1 conv == per-pixel channel matmul.  K stays f32 (small K-dim in the
    # energy matmul); V is cast to bf16 for the large attn @ V matmul.
    xd_flat = x_down.reshape(B, C, n)
    k_proj = (jnp.einsum("oc,bcn->bon", params["wk"], xd_flat)
              + params["bk"].reshape(1, C8, 1)).astype(jnp.float32)      # (B, C8, n)
    v_proj = (jnp.einsum("oc,bcn->bno", params["wv"], xd_flat)
              + params["bv"].reshape(1, 1, C)).astype(jnp.bfloat16)      # (B, n, C)

    # ---- Two free views of x (same contiguous buffer, no transpose pass):
    x_cn = x_nchw.reshape(B, C, N)     # native (channels, pixels): query source
    x_res = x_nchw.reshape(B, N, C)    # raw reinterpretation (torch .view semantics)

    # ---- Pixel-axis padding so the query tile is always a multiple of 128
    # (never a single monolithic tile).
    N_pad = -(-N // 128) * 128
    if N_pad != N:
        x_cn = jnp.pad(x_cn, ((0, 0), (0, 0), (0, N_pad - N)))
        x_res = jnp.pad(x_res, ((0, 0), (0, N_pad - N), (0, 0)))

    cap, vmem_limit = _hw_tile_params(C, n)
    TQ = _choose_q_block(N_pad, cap, q_block)
    NQ = N_pad // TQ

    wq_b = params["wq"].astype(jnp.bfloat16)                 # (C8, C)
    bq_r = params["bq"].reshape(C8, 1).astype(jnp.float32)   # (C8, 1)
    gamma = params["gamma"].reshape(1, 1).astype(jnp.float32)

    vmem = pltpu.MemorySpace.VMEM
    # TODO(synk): for df == 1 on very large images, K/V (B, n, C) may not fit as
    # whole-array VMEM operands; switch them to per-batch gridded blocks then.
    # TODO(synk): for C < 128 a lane-dense (B, N*C/128, 128) output view would
    # avoid masked partial stores; irrelevant for production C >= 128.
    out = pl.pallas_call(
        self_attention_kernel,
        out_shape=jax.ShapeDtypeStruct((B, N_pad, C), out_dtype),
        grid=(B, NQ),
        in_specs=[
            pl.BlockSpec(memory_space=pltpu.MemorySpace.SMEM),   # gamma scalar
            pl.BlockSpec((1, C, TQ), lambda b, q: (b, 0, q)),    # x, native layout
            pl.BlockSpec((1, TQ, C), lambda b, q: (b, q, 0)),    # residual slab
            pl.BlockSpec(memory_space=vmem),                     # K    (B, C8, n)
            pl.BlockSpec(memory_space=vmem),                     # V    (B, n, C)
            pl.BlockSpec(memory_space=vmem),                     # Wq   (C8, C)
            pl.BlockSpec(memory_space=vmem),                     # bq   (C8, 1)
        ],
        out_specs=pl.BlockSpec((1, TQ, C), lambda b, q: (b, q, 0)),
        compiler_params=pltpu.CompilerParams(
            dimension_semantics=("parallel", "parallel"),
            vmem_limit_bytes=vmem_limit),
    )(gamma, x_cn, x_res, k_proj, v_proj, wq_b, bq_r)

    if N_pad != N:
        out = out[:, :N, :]
    # torch: `out.view(B, C, H, W)` on the (B, HW, C) tensor is a raw memory
    # reinterpretation -> plain row-major reshape of the kernel output.
    return out.reshape(B, C, H, W)


# --------------------------------------------------------------------------
# Pure-JAX reference (mirrors the PyTorch forward exactly) for validation
# --------------------------------------------------------------------------
def reference_forward(x_nchw, params, downsample_factor=4):
    B, C, H, W = x_nchw.shape
    df = downsample_factor
    if df > 1:
        h, w = H // df, W // df
        x_down = x_nchw.reshape(B, C, h, df, w, df).mean(axis=(3, 5))
    else:
        h, w = H, W
        x_down = x_nchw

    def conv1x1(y, wgt, bias):
        Bz, Ci, hh, ww = y.shape
        yf = y.reshape(Bz, Ci, hh * ww)
        return jnp.einsum("oc,bcn->bon", wgt, yf) + bias.reshape(1, -1, 1)

    proj_query = conv1x1(x_nchw, params["wq"], params["bq"])          # (B, C8, HW)
    proj_key = conv1x1(x_down, params["wk"], params["bk"])            # (B, C8, hw)
    proj_value = conv1x1(x_down, params["wv"], params["bv"])          # (B, C,  hw)
    proj_query = jnp.transpose(proj_query, (0, 2, 1))                 # (B, HW, C8)

    energy = jnp.einsum("bqc,bck->bqk", proj_query, proj_key)
    attention = jax.nn.softmax(energy, axis=-1)
    out = jnp.einsum("bqk,bck->bqc", attention, proj_value)           # (B, HW, C)
    out_chw = out.reshape(B, C, H, W)                                 # torch .view
    return params["gamma"].reshape(()) * out_chw + x_nchw


if __name__ == "__main__":
    B, C, H, W = 2, 64, 16, 16      # C divisible by 8; H, W divisible by df
    df = 4
    C8 = C // 8

    key = jax.random.PRNGKey(0)
    kx, kq, kbq, kk, kbk, kv, kbv = jax.random.split(key, 7)

    x = jax.random.normal(kx, (B, C, H, W), jnp.float32)

    params = {
        "wq": jax.random.normal(kq, (C8, C), jnp.float32) * 0.1,
        "bq": jax.random.normal(kbq, (C8,), jnp.float32) * 0.1,
        "wk": jax.random.normal(kk, (C8, C), jnp.float32) * 0.1,
        "bk": jax.random.normal(kbk, (C8,), jnp.float32) * 0.1,
        "wv": jax.random.normal(kv, (C, C), jnp.float32) * 0.1,
        "bv": jax.random.normal(kbv, (C,), jnp.float32) * 0.1,
        # Module initializes gamma = zeros(1); nonzero value exercises the
        # fused residual epilogue numerically.
        "gamma": jnp.full((1,), 0.37, jnp.float32),
    }

    fwd = jax.jit(self_attention_forward,
                  static_argnames=("downsample_factor", "q_block", "out_dtype"))
    # q_block=128 -> grid (B=2, NQ=2): exercises the query tiling on a small shape.
    out = fwd(x, params, downsample_factor=df, q_block=128)
    out = jax.block_until_ready(out)

    ref = reference_forward(x, params, downsample_factor=df)
    max_err = float(jnp.max(jnp.abs(out - ref)))
    assert jnp.allclose(out, ref, atol=3e-2, rtol=3e-2), \
        f"output mismatch, max|err|={max_err}"

    print("KERNEL_OK")
</pallas_src>

<mosaic_0001>
module attributes {stable_mosaic.version = 11 : i64} {
  func.func @self_attention_kernel(%arg0: i32, %arg1: i32, %arg2: memref<1x1xf32, #tpu.memory_space<smem>>, %arg3: memref<1x64x128xf32, #tpu.memory_space<vmem>>, %arg4: memref<1x128x64xf32, #tpu.memory_space<vmem>>, %arg5: memref<2x8x16xf32, #tpu.memory_space<vmem>>, %arg6: memref<2x16x64xbf16, #tpu.memory_space<vmem>>, %arg7: memref<8x64xbf16, #tpu.memory_space<vmem>>, %arg8: memref<8x1xf32, #tpu.memory_space<vmem>>, %arg9: memref<1x128x64xf32, #tpu.memory_space<vmem>>) attributes {dimension_semantics = [#tpu.dimension_semantics<parallel>, #tpu.dimension_semantics<parallel>], iteration_bounds = array<i64: 2, 2>, scalar_prefetch = 0 : i64, scratch_operands = 0 : i64, tpu.core_type = #tpu.core_type<tc>, window_params = [{transform_indices = @transform_0, window_bounds = array<i64: 1, 1>}, {transform_indices = @transform_1, window_bounds = array<i64: 1, 64, 128>}, {transform_indices = @transform_2, window_bounds = array<i64: 1, 128, 64>}, {pipeline_mode = #tpu.pipeline_mode<synchronous>, transform_indices = @transform_3, window_bounds = array<i64: 2, 8, 16>}, {pipeline_mode = #tpu.pipeline_mode<synchronous>, transform_indices = @transform_4, window_bounds = array<i64: 2, 16, 64>}, {pipeline_mode = #tpu.pipeline_mode<synchronous>, transform_indices = @transform_5, window_bounds = array<i64: 8, 64>}, {pipeline_mode = #tpu.pipeline_mode<synchronous>, transform_indices = @transform_6, window_bounds = array<i64: 8, 1>}, {transform_indices = @transform_7, window_bounds = array<i64: 1, 128, 64>}]} {
    %c0 = arith.constant 0 : index
    %c0_0 = arith.constant 0 : index
    %c0_1 = arith.constant 0 : index
    %0 = vector.load %arg3[%c0, %c0_0, %c0_1] : memref<1x64x128xf32, #tpu.memory_space<vmem>>, vector<1x64x128xf32>
    %1 = vector.shape_cast %0 : vector<1x64x128xf32> to vector<64x128xf32>
    %c0_2 = arith.constant 0 : index
    %c0_3 = arith.constant 0 : index
    %2 = vector.load %arg7[%c0_2, %c0_3] : memref<8x64xbf16, #tpu.memory_space<vmem>>, vector<8x64xbf16>
    %3 = arith.truncf %1 : vector<64x128xf32> to vector<64x128xbf16>
    %cst = arith.constant dense<0.000000e+00> : vector<8x128xf32>
    %4 = tpu.matmul %2, %3, %cst {dimension_numbers = #tpu.dot_dimension_numbers<[1], [0], [0], [1], [0, 0, 1, 1], [], []>} : vector<8x64xbf16>, vector<64x128xbf16>, vector<8x128xf32> -> vector<8x128xf32>
    %c0_4 = arith.constant 0 : index
    %c0_5 = arith.constant 0 : index
    %5 = vector.load %arg8[%c0_4, %c0_5] : memref<8x1xf32, #tpu.memory_space<vmem>>, vector<8x1xf32>
    %6 = vector.broadcast %5 : vector<8x1xf32> to vector<8x128xf32>
    %7 = arith.addf %4, %6 : vector<8x128xf32>
    %8 = arith.index_cast %arg0 : i32 to index
    %c0_6 = arith.constant 0 : index
    %c0_7 = arith.constant 0 : index
    %9 = vector.load %arg5[%8, %c0_6, %c0_7] : memref<2x8x16xf32, #tpu.memory_space<vmem>>, vector<1x8x16xf32>
    %10 = vector.shape_cast %9 : vector<1x8x16xf32> to vector<8x16xf32>
    %cst_8 = arith.constant dense<0.000000e+00> : vector<128x16xf32>
    %11 = tpu.matmul %7, %10, %cst_8 {dimension_numbers = #tpu.dot_dimension_numbers<[0], [0], [1], [1], [0, 1, 1, 1], [], []>} : vector<8x128xf32>, vector<8x16xf32>, vector<128x16xf32> -> vector<128x16xf32>
    %cst_9 = arith.constant dense<0xFF800000> : vector<128xf32>
    %12 = vector.multi_reduction <maximumf>, %11, %cst_9 [1] : vector<128x16xf32> to vector<128xf32>
    %13 = vector.shape_cast %12 : vector<128xf32> to vector<128x1xf32>
    %14 = vector.broadcast %13 : vector<128x1xf32> to vector<128x16xf32>
    %15 = arith.subf %11, %14 : vector<128x16xf32>
    %16 = math.exp %15 : vector<128x16xf32>
    %cst_10 = arith.constant dense<0.000000e+00> : vector<128xf32>
    %17 = vector.multi_reduction <add>, %16, %cst_10 [1] : vector<128x16xf32> to vector<128xf32>
    %18 = vector.shape_cast %17 : vector<128xf32> to vector<128x1xf32>
    %19 = tpu.reciprocal %18 : vector<128x1xf32> -> vector<128x1xf32>
    %20 = vector.broadcast %19 : vector<128x1xf32> to vector<128x16xf32>
    %21 = arith.mulf %16, %20 : vector<128x16xf32>
    %22 = arith.truncf %21 : vector<128x16xf32> to vector<128x16xbf16>
    %23 = arith.index_cast %arg0 : i32 to index
    %c0_11 = arith.constant 0 : index
    %c0_12 = arith.constant 0 : index
    %24 = vector.load %arg6[%23, %c0_11, %c0_12] : memref<2x16x64xbf16, #tpu.memory_space<vmem>>, vector<1x16x64xbf16>
    %25 = vector.shape_cast %24 : vector<1x16x64xbf16> to vector<16x64xbf16>
    %cst_13 = arith.constant dense<0.000000e+00> : vector<128x64xf32>
    %26 = tpu.matmul %22, %25, %cst_13 {dimension_numbers = #tpu.dot_dimension_numbers<[1], [0], [0], [1], [0, 0, 1, 1], [], []>} : vector<128x16xbf16>, vector<16x64xbf16>, vector<128x64xf32> -> vector<128x64xf32>
    %c0_14 = arith.constant 0 : index
    %c0_15 = arith.constant 0 : index
    %27 = memref.load %arg2[%c0_14, %c0_15] : memref<1x1xf32, #tpu.memory_space<smem>>
    %28 = vector.broadcast %27 : f32 to vector<128x64xf32>
    %29 = arith.mulf %28, %26 : vector<128x64xf32>
    %c0_16 = arith.constant 0 : index
    %c0_17 = arith.constant 0 : index
    %c0_18 = arith.constant 0 : index
    %30 = vector.load %arg4[%c0_16, %c0_17, %c0_18] : memref<1x128x64xf32, #tpu.memory_space<vmem>>, vector<1x128x64xf32>
    %31 = vector.shape_cast %30 : vector<1x128x64xf32> to vector<128x64xf32>
    %32 = arith.addf %29, %31 : vector<128x64xf32>
    %c0_19 = arith.constant 0 : index
    %c0_20 = arith.constant 0 : index
    %c0_21 = arith.constant 0 : index
    %33 = vector.load %arg9[%c0_19, %c0_20, %c0_21] : memref<1x128x64xf32, #tpu.memory_space<vmem>>, vector<1x128x64xf32>
    %34 = vector.shape_cast %33 : vector<1x128x64xf32> to vector<128x64xf32>
    %35 = vector.shape_cast %32 : vector<128x64xf32> to vector<1x128x64xf32>
    tpu.vector_store %arg9[%c0_19, %c0_20, %c0_21], %35 {strides = array<i32>} : memref<1x128x64xf32, #tpu.memory_space<vmem>>, vector<1x128x64xf32>,
    return
  }
  func.func @transform_0(%arg0: i32, %arg1: i32) -> (i32, i32) {
    %c0_i32 = arith.constant 0 : i32
    %c0_i32_0 = arith.constant 0 : i32
    %c0_i32_1 = arith.constant 0 : i32
    return %c0_i32, %c0_i32_0 : i32, i32
  }
  func.func @transform_1(%arg0: i32, %arg1: i32) -> (i32, i32, i32) {
    %c0_i32 = arith.constant 0 : i32
    %c0_i32_0 = arith.constant 0 : i32
    return %arg0, %c0_i32, %arg1 : i32, i32, i32
  }
  func.func @transform_2(%arg0: i32, %arg1: i32) -> (i32, i32, i32) {
    %c0_i32 = arith.constant 0 : i32
    %c0_i32_0 = arith.constant 0 : i32
    return %arg0, %arg1, %c0_i32 : i32, i32, i32
  }
  func.func @transform_3(%arg0: i32, %arg1: i32) -> (i32, i32, i32) {
    %c0_i32 = arith.constant 0 : i32
    %c0_i32_0 = arith.constant 0 : i32
    %c0_i32_1 = arith.constant 0 : i32
    %c0_i32_2 = arith.constant 0 : i32
    return %c0_i32, %c0_i32_0, %c0_i32_1 : i32, i32, i32
  }
  func.func @transform_4(%arg0: i32, %arg1: i32) -> (i32, i32, i32) {
    %c0_i32 = arith.constant 0 : i32
    %c0_i32_0 = arith.constant 0 : i32
    %c0_i32_1 = arith.constant 0 : i32
    %c0_i32_2 = arith.constant 0 : i32
    return %c0_i32, %c0_i32_0, %c0_i32_1 : i32, i32, i32
  }
  func.func @transform_5(%arg0: i32, %arg1: i32) -> (i32, i32) {
    %c0_i32 = arith.constant 0 : i32
    %c0_i32_0 = arith.constant 0 : i32
    %c0_i32_1 = arith.constant 0 : i32
    return %c0_i32, %c0_i32_0 : i32, i32
  }
  func.func @transform_6(%arg0: i32, %arg1: i32) -> (i32, i32) {
    %c0_i32 = arith.constant 0 : i32
    %c0_i32_0 = arith.constant 0 : i32
    %c0_i32_1 = arith.constant 0 : i32
    return %c0_i32, %c0_i32_0 : i32, i32
  }
  func.func @transform_7(%arg0: i32, %arg1: i32) -> (i32, i32, i32) {
    %c0_i32 = arith.constant 0 : i32
    %c0_i32_0 = arith.constant 0 : i32
    return %arg0, %arg1, %c0_i32 : i32, i32, i32
  }
}

</mosaic_0001>

<bundles_post_ra>
// kernel: self_attention_forward.1
= control target key start
LH: loop header
LB: loop body
LE: loop exit
PB: predicated region body
PF: predicated region fallthrough
CT: control target
= control target key end

     0   :  { %s1969_s0 = inlined_call_operand.<no memory space> [shape: f32[1,1], index: 0, kind: input, shape index: {}]   ;;  %s1970_s1 = inlined_call_operand.vmem [shape: f32[2,64,256], index: 1, kind: input, shape index: {}]   ;;  %s1971_s2 = inlined_call_operand.vmem [shape: f32[2,256,64], index: 2, kind: input, shape index: {}]   ;;  %s1972_s3 = inlined_call_operand.vmem [shape: f32[2,8,16], index: 3, kind: input, shape index: {}]   ;;  %s1973_s4 = inlined_call_operand.vmem [shape: bf16[2,16,64], index: 4, kind: input, shape index: {}]   ;;  %s1974_s5 = inlined_call_operand.vmem [shape: bf16[8,64], index: 5, kind: input, shape index: {}]   ;;  %s1975_s6 = inlined_call_operand.vmem [shape: f32[8,1], index: 6, kind: input, shape index: {}]   ;;  %s1976_s7 = inlined_call_operand.vmem [shape: f32[2,256,64], index: 7, kind: output, shape index: {}]  }
   0x1   :  { %12 = sst [smem:[#allocation2]] %s1969_s0 }
   0x2   :  { %s1525_s26 = smov 0   ;;  %s1527_s27 = smov 0  }
   0x3   :  { %s1529_s28 = smov 0   ;;  %s1531_s29 = smov 0  }
   0x4   :  { %s1533_s30 = smov 0   ;;  %s1535_s8 = smov 0  }
   0x5   :  { %s1537_s9 = smov 0  }
   0x6 LB: > { %s27_s0 = sadd.s32 1, %s1471_s30  ;;  %s30_s10 = sadd.s32 1, %s1475_s8  ;;  %s1479_s9 = sphi %s1537_s9, %s18_s9   ;;  %s1475_s8 = sphi %s1535_s8, %s1998_s8   ;;  %s1471_s30 = sphi %s1533_s30, %s1997_s30   ;;  %s1467_s29 = sphi %s1531_s29, %s1996_s29   ;;  %s1463_s28 = sphi %s1529_s28, %s1995_s28   ;;  %s1459_s27 = sphi %s1527_s27, %s1994_s27   ;;  %s1455_s26 = sphi %s1525_s26, %s1993_s26  }
   0x7   : > { %p28_p0 = scmp.ge.s32.totalorder %s27_s0, 2  ;;  %p67_p1 = scmp.ne.s32.totalorder %s1459_s27, %s1455_s26 }
   0x8   : > { %p68_p2 = scmp.eq.s32.totalorder %s1479_s9, 0  ;;  %s60_s14 = sadd.s32 1, %s1459_s27 }
   0x9   : > { %s2000_s0 = smov (%p28_p0, %s27_s0), 0  ;;  %s2002_s10 = smov (!%p28_p0, %s30_s10), %s1475_s8 }
   0xa   : > { %p69_p3 = por %p68_p2, %p67_p1  ;;  %p32_p4 = scmp.ge.s32.totalorder %s2002_s10, 2 }
   0xb   : > { %s56_s11 = ssub.s32 %s1471_s30, %s2000_s0  ;;  %p1252_p6 = scmp.ge.s32.totalorder %s1479_s9, 4 }
   0xc   : > { %s2004_s10 = smov (%p32_p4, %s2002_s10), 0 }
   0xd   : > { %s55_s12 = ssub.s32 %s1475_s8, %s2004_s10  ;;  %248 = sbr.rel (%p1252_p6) target bundleno = 32 (0x20), region = 36 }
   0xe   : > { %s57_s13 = sor.u32 %s56_s11, %s55_s12 }
   0xf   : > { %p58_p5 = scmp.eq.s32.totalorder %s57_s13, 0 }
  0x11   : > { %s1576_s15 = scalar_select %p58_p5, %s1459_s27, %s60_s14  }
  0x12   : > { %251 = sbr.rel (!%p69_p3) target bundleno = 32 (0x20), region = 40  ;;  %s253_s16 = sand.u32 (%p69_p3), 1, %s1459_s27  }
  0x13   : > { %s1254_s17 = sshll.u32 (%p69_p3), %s1475_s8, 4  ;;  %s1253_s18 = sshll.u32 (%p69_p3), %s253_s16, 6 }
  0x14   : > { %s257_s19 = sadd.s32 (%p69_p3), %s1471_s30, %s1254_s17  ;;  %s255_s24 = scalar_lea.vmem (%p69_p3), [#allocation3], %s1253_s18 }
  0x15   : > { %s1255_s20 = sshll.u32 (%p69_p3), %s257_s19, 3 }
  0x16   : > { %s259_s23 = scalar_lea.vmem (%p69_p3), %s1970_s1, %s1255_s20 }
  0x17   : > { %v302_v0 = vld [vmem:[%s259_s23] sm:$0xff]  ;;  %v304_v1 = vld [vmem:[%s259_s23 + $0x10] sm:$0xff] }
  0x18   : > { %v306_v2 = vld [vmem:[%s259_s23 + $0x20] sm:$0xff]  ;;  %303 = vst [vmem:[%s255_s24] sm:$0xff] %v302_v0  ;;  %v308_v3 = vld [vmem:[%s259_s23 + $0x30] sm:$0xff] }
  0x19   : > { %305 = vst [vmem:[%s255_s24 + $0x8] sm:$0xff] %v304_v1  ;;  %v310_v4 = vld [vmem:[%s259_s23 + $0x40] sm:$0xff]  ;;  %v312_v5 = vld [vmem:[%s259_s23 + $0x50] sm:$0xff] }
  0x1a   : > { %307 = vst [vmem:[%s255_s24 + $0x10] sm:$0xff] %v306_v2  ;;  %v314_v6 = vld [vmem:[%s259_s23 + $0x60] sm:$0xff]  ;;  %v316_v7 = vld [vmem:[%s259_s23 + $0x70] sm:$0xff] }
  0x1b   : > { %309 = vst [vmem:[%s255_s24 + $0x18] sm:$0xff] %v308_v3 }
  0x1c   : > { %311 = vst [vmem:[%s255_s24 + $0x20] sm:$0xff] %v310_v4 }
  0x1d   : > { %313 = vst [vmem:[%s255_s24 + $0x28] sm:$0xff] %v312_v5 }
  0x1e   : > { %315 = vst [vmem:[%s255_s24 + $0x30] sm:$0xff] %v314_v6 }
  0x1f   : > { %317 = vst [vmem:[%s255_s24 + $0x38] sm:$0xff] %v316_v7 }
  0x20 PF: > { %p1256_p7 = scmp.ge.s32.totalorder %s1479_s9, 1  ;;  %p335_p8 = scmp.lt.s32.totalorder %s1479_s9, 5 }
  0x22   : > { %p336_p9 = pnand %p1256_p7, %p335_p8 }
  0x23   : > { %s342_s25 = sand.u32 (!%p336_p9), 1, %s1455_s26   ;;  %s1265_s17 = sshll.u32 (!%p336_p9), %s1467_s29, 3 }
  0x24   : > { %339 = sbr.rel (%p336_p9) target bundleno = 1039 (0x40f), region = 82  ;;  %s1257_s13 = sshll.u32 (!%p336_p9), %s342_s25, 6 }
  0x25   : > { %s344_s14 = scalar_lea.vmem (!%p336_p9), [#allocation3], %s1257_s13  ;;  %s444_s20 = scalar_lea.vmem (!%p336_p9), %s1972_s3, %s1265_s17 }
  0x26   : > { %s987_s23 = scalar_lea.vmem (!%p336_p9), %s1973_s4, %s1265_s17  ;;  %s1258_s24 = sshll.u32 (!%p336_p9), %s1463_s28, 4 }
  0x27   : > { %p387_p10 = scmp.lt.s32.totalorder (!%p336_p9), %s1467_s29, 1  ;;  %p389_p11 = scmp.lt.s32.totalorder (!%p336_p9), %s1258_s24, 31 }
  0x28   : > { %s1069_s11 = sld [smem:[#allocation2]] (!%p336_p9) }
  0x29   : > { %v420_v8 = vld [vmem:[%s1975_s6] sm:$0xff]  ;;  %v1481_v9 = vmov 0   ;;  %v413_v10 = vld [vmem:[%s344_s14 + $0x30] sm:$0xff]  ;;  %v414_v11 = vld [vmem:[%s344_s14 + $0x38] sm:$0xff]  ;;  %vm426_vm0 = vcmask 523264   ;;  %vm478_vm1 = vcmask 64512  }
  0x2a   : > { %1360 = vset.pattern.permute.xlu0 %v1481_v9  ;;  %v411_v12 = vld [vmem:[%s344_s14 + $0x20] sm:$0xff]  ;;  %v419_v13 = vpack.c.bf16 %v414_v11, %v413_v10  ;;  %v412_v14 = vld [vmem:[%s344_s14 + $0x28] sm:$0xff]  ;;  %v409_v16 = vld [vmem:[%s344_s14 + $0x10] sm:$0xff]  ;;  %vm592_vm2 = vcmask 130048   ;;  %s2006_s29 = smov (!%p387_p10, %s1467_s29), 1  ;;  %s2008_s24 = smov (!%p389_p11, %s1258_s24), 31 }
  0x2b   : > { %423 = vperm.xlu0 %1360, %v420_v8   ;;  %v418_v15 = vpack.c.bf16 %v412_v14, %v411_v12  ;;  %v410_v17 = vld [vmem:[%s344_s14 + $0x18] sm:$0xff]  ;;  %v407_v19 = vld [vmem:[%s344_s14] sm:$0xff]  ;;  %v408_v20 = vld [vmem:[%s344_s14 + $0x8] sm:$0xff]  ;;  %s1259_s25 = sshll.u32 %s2006_s29, 5 }
  0x2c   : > { %434 = vmatpush.bf16.msra.mxu3 %v419_v13  ;;  %v417_v18 = vpack.c.bf16 %v410_v17, %v409_v16  ;;  %v416_v21 = vpack.c.bf16 %v408_v20, %v407_v19  ;;  %v415_v22 = vld [vmem:[%s1974_s5] sm:$0xf]  ;;  %s1860_s12 = sadd.s32 %s1259_s25, %s2008_s24 }
  0x2d   : > { %v445_v23 = vld [vmem:[%s444_s20] sm:$0xff]  ;;  %s1260_s28 = sshll.u32 %s1860_s12, 3 }
  0x2e   : > { %542 = vmatpush.msra.mxu0 %v445_v23  ;;  %1300 = vmatpush.msra.mxu1 %v445_v23  ;;  %s1872_s14 = scalar_lea.vmem %s1971_s2, %s1260_s28  ;;  %s1883_s17 = scalar_lea.vmem %s1976_s7, %s1260_s28 }
  0x30   : > { %435 = vmatpush.bf16.msra.mxu3 %v418_v15 }
  0x34   : > { %436 = vmatpush.bf16.msra.mxu3 %v417_v18 }
  0x38   : > { %437 = vmatpush.bf16.msra.mxu3 %v416_v21 }
  0x3b   : > { %1264 = vmatmul.msk.bf16.vlgmr.msra.gmra.mxu3 %vm426_vm0, %v415_v22 }
  0x9d   : > { %v424_v24 = vpop.permute.xlu0 %423 }
  0xbe   : > { %v439_v25 = vpop.f32.mrf.mxu3 }
  0xbf   : > { %v440_v26 = vadd.f32 %v439_v25, %v424_v24 }
  0xc1   : > { %446 = vxpose.xlu0.b32.start.end [1/1] (short) %v440_v26, 128 }
  0xc6   : > { %v441_v27 = vpop.f32.mrf.mxu3 }
 0x165   : > { %v462_v28 = vpop.trf.xlu0 }
 0x166   : > { %1266 = vmatmul.msk.f32.vlgmr.msra.gmra.mxu0 %vm478_vm1, %v462_v28 }
 0x16d   : > { %v463_v29 = vpop.trf.xlu0 }
 0x16e   : > { %1267 = vmatmul.msk.f32.gmra.mxu0 %vm478_vm1, %v463_v29 }
 0x175   : > { %v464_v30 = vpop.trf.xlu0 }
 0x176   : > { %1268 = vmatmul.msk.f32.gmra.mxu0 %vm478_vm1, %v464_v30 }
 0x17d   : > { %v465_v31 = vpop.trf.xlu0 }
 0x17e   : > { %1269 = vmatmul.msk.f32.gmra.mxu0 %vm478_vm1, %v465_v31 }
 0x185   : > { %v466_v32 = vpop.trf.xlu0 }
 0x186   : > { %1270 = vmatmul.msk.f32.gmra.mxu0 %vm478_vm1, %v466_v32 }
 0x18d   : > { %v467_v33 = vpop.trf.xlu0 }
 0x18e   : > { %1271 = vmatmul.msk.f32.gmra.mxu0 %vm478_vm1, %v467_v33 }
 0x195   : > { %v468_v34 = vpop.trf.xlu0 }
 0x196   : > { %1272 = vmatmul.msk.f32.gmra.mxu0 %vm478_vm1, %v468_v34 }
 0x19d   : > { %v469_v35 = vpop.trf.xlu0 }
 0x19e   : > { %1273 = vmatmul.msk.f32.vlgmr.msra.gmra.mxu1 %vm478_vm1, %v469_v35 }
 0x1a5   : > { %v470_v36 = vpop.trf.xlu0 }
 0x1a6   : > { %1274 = vmatmul.msk.f32.gmra.mxu1 %vm478_vm1, %v470_v36 }
 0x1ad   : > { %v471_v37 = vpop.trf.xlu0 }
 0x1ae   : > { %1275 = vmatmul.msk.f32.gmra.mxu1 %vm478_vm1, %v471_v37 }
 0x1b5   : > { %v472_v38 = vpop.trf.xlu0 }
 0x1b6   : > { %1276 = vmatmul.msk.f32.gmra.mxu1 %vm478_vm1, %v472_v38 }
 0x1bd   : > { %v473_v39 = vpop.trf.xlu0 }
 0x1be   : > { %1277 = vmatmul.msk.f32.gmra.mxu1 %vm478_vm1, %v473_v39 }
 0x1c5   : > { %v474_v40 = vpop.trf.xlu0 }
 0x1c6   : > { %1278 = vmatmul.msk.f32.gmra.mxu1 %vm478_vm1, %v474_v40 }
 0x1cd   : > { %v475_v41 = vpop.trf.xlu0 }
 0x1ce   : > { %1279 = vmatmul.msk.f32.gmra.mxu1 %vm478_vm1, %v475_v41 }
 0x1d5   : > { %v476_v42 = vpop.trf.xlu0 }
 0x1d6   : > { %1280 = vmatmul.msk.f32.gmra.mxu1 %vm478_vm1, %v476_v42 }
 0x1dd   : > { %v477_v43 = vpop.trf.xlu0 }
 0x1de   : > { %1281 = vmatmul.msk.f32.gmra.mxu1 %vm478_vm1, %v477_v43 }
 0x1e3   : > { %v544_v44 = vpop.f32.mrf.mxu0 }
 0x1e4   : > { %v593_v45 = vsel %vm592_vm2, %v544_v44, -inf }
 0x1e5   : > { %594 = vmax.xlane.f32.xlu1 %v593_v45 }
 0x1eb   : > { %v547_v46 = vpop.f32.mrf.mxu0 }
 0x1ec   : > { %v596_v47 = vsel %vm592_vm2, %v547_v46, -inf }
 0x1ed   : > { %597 = vmax.xlane.f32.xlu1 %v596_v47 }
 0x1f3   : > { %v550_v48 = vpop.f32.mrf.mxu0 }
 0x1f4   : > { %v599_v49 = vsel %vm592_vm2, %v550_v48, -inf }
 0x1f5   : > { %600 = vmax.xlane.f32.xlu2 %v599_v49 }
 0x1fb   : > { %v553_v50 = vpop.f32.mrf.mxu0 }
 0x1fc   : > { %v602_v51 = vsel %vm592_vm2, %v553_v50, -inf }
 0x1fd   : > { %603 = vmax.xlane.f32.xlu2 %v602_v51 }
 0x203   : > { %v1621_v52 = vpop.f32.mrf.mxu0 }
 0x204   : > { %v605_v53 = vsel %vm592_vm2, %v1621_v52, -inf }
 0x205   : > { %606 = vmax.xlane.f32.xlu1 %v605_v53 }
 0x20b   : > { %v1625_v54 = vpop.f32.mrf.mxu0 }
 0x20c   : > { %v608_v55 = vsel %vm592_vm2, %v1625_v54, -inf }
 0x20d   : > { %609 = vmax.xlane.f32.xlu2 %v608_v55 }
 0x213   : > { %v1629_v56 = vpop.f32.mrf.mxu0 }
 0x214   : > { %v611_v57 = vsel %vm592_vm2, %v1629_v56, -inf }
 0x215   : > { %612 = vmax.xlane.f32.xlu1 %v611_v57 }
 0x21b   : > { %v1633_v58 = vpop.f32.mrf.mxu1 }
 0x21c   : > { %v614_v2 = vsel %vm592_vm2, %v1633_v58, -inf }
 0x223   : > { %v1635_v59 = vpop.f32.mrf.mxu1 }
 0x224   : > { %v617_v7 = vsel %vm592_vm2, %v1635_v59, -inf }
 0x22b   : > { %v1637_v60 = vpop.f32.mrf.mxu1 }
 0x22c   : > { %v620_v5 = vsel %vm592_vm2, %v1637_v60, -inf }
 0x233   : > { %v1639_v61 = vpop.f32.mrf.mxu1 }
 0x234   : > { %v623_v62 = vsel %vm592_vm2, %v1639_v61, -inf }
 0x235   : > { %624 = vmax.xlane.f32.xlu1 %v623_v62 }
 0x23b   : > { %v1643_v63 = vpop.f32.mrf.mxu1 }
 0x23c   : > { %v626_v0 = vsel %vm592_vm2, %v1643_v63, -inf }
 0x23d   : > { %627 = vmax.xlane.f32.xlu2 %v626_v0 }
 0x243   : > { %v1647_v1 = vpop.f32.mrf.mxu1 }
 0x244   : > { %v629_v3 = vsel %vm592_vm2, %v1647_v1, -inf }
 0x245   : > { %615 = vmax.xlane.f32.xlu2 %v614_v2  ;;  %630 = vmax.xlane.f32.xlu1 %v629_v3 }
 0x24b   : > { %v1653_v4 = vpop.f32.mrf.mxu1 }
 0x24c   : > { %v632_v6 = vsel %vm592_vm2, %v1653_v4, -inf }
 0x24d   : > { %621 = vmax.xlane.f32.xlu1 %v620_v5  ;;  %633 = vmax.xlane.f32.xlu2 %v632_v6 }
 0x253   : > { %v1661_v8 = vpop.f32.mrf.mxu1 }
 0x254   : > { %v635_v11 = vsel %vm592_vm2, %v1661_v8, -inf }
 0x255   : > { %618 = vmax.xlane.f32.xlu2 %v617_v7 }
 0x258   : > { %v595_v9 = vpop.xlane.xlu1 %594 }
 0x259   : > { %v641_v10 = vsub.f32 %v544_v44, %v595_v9 }
 0x25b   : > { %v657_v12 = vmul.f32 1.442695, %v641_v10  ;;  %v1673_v23 = vpop.f32.mrf.mxu1 }
 0x25c   : > { %v638_v26 = vsel %vm592_vm2, %v1673_v23, -inf }
 0x25d   : > { %1361 = vpow2.f32 %v657_v12  ;;  %636 = vmax.xlane.f32.xlu2 %v635_v11 }
 0x260   : > { %v598_v13 = vpop.xlane.xlu1 %597 }
 0x261   : > { %v642_v14 = vsub.f32 %v547_v46, %v598_v13 }
 0x263   : > { %v1665_v15 = vpop.eup %1361  ;;  %v659_v16 = vmul.f32 1.442695, %v642_v14 }
 0x264   : > { %v689_v17 = vsel %vm592_vm2, %v1665_v15, 0.0 }
 0x265   : > { %1363 = vpow2.f32 %v659_v16  ;;  %690 = vadd.xlane.f32.xlu0 %v689_v17 }
 0x268   : > { %v601_v18 = vpop.xlane.xlu2 %600 }
 0x269   : > { %v643_v19 = vsub.f32 %v550_v48, %v601_v18 }
 0x26b   : > { %v1669_v20 = vpop.eup %1363  ;;  %v661_v21 = vmul.f32 1.442695, %v643_v19 }
 0x26c   : > { %v692_v22 = vsel %vm592_vm2, %v1669_v20, 0.0 }
 0x26d   : > { %1365 = vpow2.f32 %v661_v21  ;;  %693 = vadd.xlane.f32.xlu1 %v692_v22 }
 0x270   : > { %v604_v24 = vpop.xlane.xlu2 %603 }
 0x271   : > { %v644_v25 = vsub.f32 %v553_v50, %v604_v24 }
 0x273   : > { %v1677_v27 = vpop.eup %1365  ;;  %v663_v28 = vmul.f32 1.442695, %v644_v25 }
 0x274   : > { %v695_v29 = vsel %vm592_vm2, %v1677_v27, 0.0 }
 0x275   : > { %1367 = vpow2.f32 %v663_v28  ;;  %696 = vadd.xlane.f32.xlu2 %v695_v29  ;;  %639 = vmax.xlane.f32.xlu1 %v638_v26 }
 0x278   : > { %v607_v30 = vpop.xlane.xlu1 %606 }
 0x279   : > { %v645_v31 = vsub.f32 %v1621_v52, %v607_v30 }
 0x27b   : > { %v1682_v32 = vpop.eup %1367  ;;  %v665_v33 = vmul.f32 1.442695, %v645_v31 }
 0x27c   : > { %v698_v34 = vsel %vm592_vm2, %v1682_v32, 0.0 }
 0x27d   : > { %1369 = vpow2.f32 %v665_v33  ;;  %699 = vadd.xlane.f32.xlu1 %v698_v34 }
 0x280   : > { %v610_v35 = vpop.xlane.xlu2 %609 }
 0x281   : > { %v646_v36 = vsub.f32 %v1625_v54, %v610_v35 }
 0x283   : > { %v1687_v37 = vpop.eup %1369  ;;  %v667_v38 = vmul.f32 1.442695, %v646_v36 }
 0x284   : > { %v701_v39 = vsel %vm592_vm2, %v1687_v37, 0.0 }
 0x285   : > { %1371 = vpow2.f32 %v667_v38  ;;  %702 = vadd.xlane.f32.xlu2 %v701_v39 }
 0x288   : > { %v613_v42 = vpop.xlane.xlu1 %612 }
 0x289   : > { %v647_v45 = vsub.f32 %v1629_v56, %v613_v42 }
 0x28b   : > { %v1691_v40 = vpop.eup %1371  ;;  %v669_v47 = vmul.f32 1.442695, %v647_v45 }
 0x28c   : > { %v704_v41 = vsel %vm592_vm2, %v1691_v40, 0.0 }
 0x28d   : > { %705 = vadd.xlane.f32.xlu1 %v704_v41 }
 0x2a8   : > { %v625_v43 = vpop.xlane.xlu1 %624 }
 0x2a9   : > { %v651_v44 = vsub.f32 %v1639_v61, %v625_v43 }
 0x2ab   : > { %v677_v46 = vmul.f32 1.442695, %v651_v44 }
 0x2ad   : > { %1373 = vpow2.f32 %v677_v46 }
 0x2ae   : > { %1375 = vpow2.f32 %v669_v47 }
 0x2b0   : > { %v628_v48 = vpop.xlane.xlu2 %627 }
 0x2b1   : > { %v652_v49 = vsub.f32 %v1643_v63, %v628_v48 }
 0x2b3   : > { %v1698_v50 = vpop.eup %1373  ;;  %v679_v51 = vmul.f32 1.442695, %v652_v49 }
 0x2b4   : > { %v719_v52 = vsel %vm592_vm2, %v1698_v50, 0.0  ;;  %v1702_v55 = vpop.eup %1375 }
 0x2b5   : > { %1377 = vpow2.f32 %v679_v51  ;;  %720 = vadd.xlane.f32.xlu2 %v719_v52  ;;  %v707_v0 = vsel %vm592_vm2, %v1702_v55, 0.0 }
 0x2b8   : > { %v616_v53 = vpop.xlane.xlu2 %615  ;;  %v631_v54 = vpop.xlane.xlu1 %630 }
 0x2b9   : > { %v648_v56 = vsub.f32 %v1633_v58, %v616_v53  ;;  %v653_v57 = vsub.f32 %v1647_v1, %v631_v54 }
 0x2bb   : > { %v1706_v61 = vpop.eup %1377  ;;  %v671_v62 = vmul.f32 1.442695, %v648_v56  ;;  %v681_v63 = vmul.f32 1.442695, %v653_v57 }
 0x2bc   : > { %v722_v2 = vsel %vm592_vm2, %v1706_v61, 0.0 }
 0x2bd   : > { %1379 = vpow2.f32 %v671_v62  ;;  %708 = vadd.xlane.f32.xlu2 %v707_v0  ;;  %723 = vadd.xlane.f32.xlu1 %v722_v2 }
 0x2be   : > { %1381 = vpow2.f32 %v681_v63 }
 0x2c0   : > { %v634_v3 = vpop.xlane.xlu2 %633  ;;  %v622_v5 = vpop.xlane.xlu1 %621 }
 0x2c1   : > { %v654_v58 = vsub.f32 %v1653_v4, %v634_v3  ;;  %v650_v9 = vsub.f32 %v1637_v60, %v622_v5 }
 0x2c3   : > { %v1713_v6 = vpop.eup %1379  ;;  %v683_v1 = vmul.f32 1.442695, %v654_v58  ;;  %v675_v12 = vmul.f32 1.442695, %v650_v9 }
 0x2c4   : > { %v1715_v7 = vpop.eup %1381  ;;  %v710_v10 = vsel %vm592_vm2, %v1713_v6, 0.0 }
 0x2c5   : > { %v725_v11 = vsel %vm592_vm2, %v1715_v7, 0.0  ;;  %711 = vadd.xlane.f32.xlu1 %v710_v10  ;;  %1383 = vpow2.f32 %v683_v1 }
 0x2c6   : > { %726 = vadd.xlane.f32.xlu2 %v725_v11  ;;  %1385 = vpow2.f32 %v675_v12 }
 0x2c8   : > { %v619_v13 = vpop.xlane.xlu2 %618 }
 0x2c9   : > { %v649_v4 = vsub.f32 %v1635_v59, %v619_v13  ;;  %v1299_v59 = vld [vmem:[%s987_s23] sm:$0xff] }
 0x2ca   : > { %1027 = vmatpush.bf16.msra.mxu2 %v1299_v59  ;;  %1301 = vmatpush.bf16.msrb.mxu3 %v1299_v59 }
 0x2cb   : > { %v673_v14 = vmul.f32 1.442695, %v649_v4  ;;  %v1723_v16 = vpop.eup %1383 }
 0x2cc   : > { %v728_v60 = vsel %vm592_vm2, %v1723_v16, 0.0  ;;  %v1733_v19 = vpop.eup %1385 }
 0x2cd   : > { %1387 = vpow2.f32 %v673_v14  ;;  %729 = vadd.xlane.f32.xlu1 %v728_v60  ;;  %v716_v25 = vsel %vm592_vm2, %v1733_v19, 0.0 }
 0x2d0   : > { %v637_v17 = vpop.xlane.xlu2 %636 }
 0x2d1   : > { %v655_v18 = vsub.f32 %v1661_v8, %v637_v17 }
 0x2d3   : > { %v1735_v21 = vpop.eup %1387  ;;  %v685_v22 = vmul.f32 1.442695, %v655_v18 }
 0x2d4   : > { %v713_v24 = vsel %vm592_vm2, %v1735_v21, 0.0 }
 0x2d5   : > { %1389 = vpow2.f32 %v685_v22  ;;  %714 = vadd.xlane.f32.xlu2 %v713_v24  ;;  %717 = vadd.xlane.f32.xlu1 %v716_v25 }
 0x2d8   : > { %v691_v26 = vpop.xlane.xlu0 %690 }
 0x2d9   : > { %1391 = vrcp.f32 %v691_v26  ;;  %v748_v42 = vand.u32 2147483648, %v691_v26  ;;  %vm742_vm4 = vweird.f32 %v691_v26  ;;  %v746_v45 = vand.u32 2147483647, %v691_v26 }
 0x2db   : > { %v1741_v8 = vpop.eup %1389  ;;  %v749_v53 = vor.u32 1.1754944e-38, %v748_v42  ;;  %vm747_vm8 = vcmp.eq.f32.partialorder %v746_v45, 8.507059e+37 }
 0x2dc   : > { %v731_v28 = vsel %vm592_vm2, %v1741_v8, 0.0 }
 0x2dd   : > { %732 = vadd.xlane.f32.xlu2 %v731_v28 }
 0x2df   : > { %v1392_v29 = vpop.eup %1391 }
 0x2e0   : > { %v738_v30 = vmul.f32 %v1392_v29, %v691_v26  ;;  %v694_v31 = vpop.xlane.xlu1 %693  ;;  %vm743_vm3 = vweird.f32 %v1392_v29 }
 0x2e1   : > { %1393 = vrcp.f32 %v694_v31  ;;  %vm1746_vm5 = vmor %vm742_vm4, %vm743_vm3  ;;  %v762_v48 = vand.u32 2147483648, %v694_v31  ;;  %v760_v52 = vand.u32 2147483647, %v694_v31  ;;  %vm756_vm7 = vweird.f32 %v694_v31 }
 0x2e2   : > { %v739_v33 = vsub.f32 1.0, %v738_v30 }
 0x2e3   : > { %vm761_vm10 = vcmp.eq.f32.partialorder %v760_v52, 8.507059e+37 }
 0x2e4   : > { %v740_v34 = vmul.f32 %v1392_v29, %v739_v33 }
 0x2e6   : > { %v741_v41 = vadd.f32 %v1392_v29, %v740_v34 }
 0x2e7   : > { %v1394_v35 = vpop.eup %1393 }
 0x2e8   : > { %v752_v36 = vmul.f32 %v1394_v35, %v694_v31  ;;  %v697_v38 = vpop.xlane.xlu2 %696  ;;  %v640_v39 = vpop.xlane.xlu1 %639  ;;  %vm757_vm6 = vweird.f32 %v1394_v35  ;;  %v745_v51 = vsel %vm1746_vm5, %v1392_v29, %v741_v41 }
 0x2e9   : > { %1395 = vrcp.f32 %v697_v38  ;;  %v656_v44 = vsub.f32 %v1673_v23, %v640_v39  ;;  %vm758_vm9 = vmor %vm756_vm7, %vm757_vm6  ;;  %v763_v23 = vor.u32 1.1754944e-38, %v762_v48  ;;  %v750_v63 = vsel %vm747_vm8, %v749_v53, %v745_v51 }
 0x2ea   : > { %v753_v43 = vsub.f32 1.0, %v752_v36  ;;  %v961_v5 = vmul.f32 %v1665_v15, %v750_v63  ;;  %v776_v60 = vand.u32 2147483648, %v697_v38  ;;  %vm770_vm12 = vweird.f32 %v697_v38 }
 0x2eb   : > { %v687_v49 = vmul.f32 1.442695, %v656_v44 }
 0x2ec   : > { %v754_v47 = vmul.f32 %v1394_v35, %v753_v43  ;;  %v777_v25 = vor.u32 1.1754944e-38, %v776_v60 }
 0x2ed   : > { %1397 = vpow2.f32 %v687_v49 }
 0x2ee   : > { %v755_v54 = vadd.f32 %v1394_v35, %v754_v47 }
 0x2ef   : > { %v1396_v56 = vpop.eup %1395 }
 0x2f0   : > { %v766_v57 = vmul.f32 %v1396_v56, %v697_v38  ;;  %v700_v62 = vpop.xlane.xlu1 %699  ;;  %v759_v0 = vsel %vm758_vm9, %v1394_v35, %v755_v54  ;;  %vm771_vm11 = vweird.f32 %v1396_v56 }
 0x2f1   : > { %1399 = vrcp.f32 %v700_v62  ;;  %v764_v3 = vsel %vm761_vm10, %v763_v23, %v759_v0  ;;  %vm1759_vm13 = vmor %vm770_vm12, %vm771_vm11  ;;  %v790_v59 = vand.u32 2147483648, %v700_v62  ;;  %v788_v22 = vand.u32 2147483647, %v700_v62 }
 0x2f2   : > { %v767_v2 = vsub.f32 1.0, %v766_v57  ;;  %v962_v58 = vmul.f32 %v1669_v20, %v764_v3  ;;  %v774_v20 = vand.u32 2147483647, %v697_v38  ;;  %vm784_vm15 = vweird.f32 %v700_v62 }
 0x2f3   : > { %v1754_v1 = vpop.eup %1397  ;;  %v791_v29 = vor.u32 1.1754944e-38, %v790_v59  ;;  %vm789_vm4 = vcmp.eq.f32.partialorder %v788_v22, 8.507059e+37 }
 0x2f4   : > { %v768_v9 = vmul.f32 %v1396_v56, %v767_v2  ;;  %v734_v10 = vsel %vm592_vm2, %v1754_v1, 0.0  ;;  %v977_v11 = vpack.c.bf16 %v962_v58, %v961_v5  ;;  %vm775_vm1 = vcmp.eq.f32.partialorder %v774_v20, 8.507059e+37 }
 0x2f5   : > { %735 = vadd.xlane.f32.xlu1 %v734_v10 }
 0x2f6   : > { %1288 = vmatmul.msk.bf16.vlgmr.msra.gmra.mxu2 %vm592_vm2, %v977_v11  ;;  %v769_v14 = vadd.f32 %v1396_v56, %v768_v9 }
 0x2f7   : > { %v1400_v12 = vpop.eup %1399 }
 0x2f8   : > { %v780_v13 = vmul.f32 %v1400_v12, %v700_v62  ;;  %v703_v4 = vpop.xlane.xlu2 %702  ;;  %vm785_vm14 = vweird.f32 %v1400_v12  ;;  %v773_v24 = vsel %vm1759_vm13, %v1396_v56, %v769_v14 }
 0x2f9   : > { %1401 = vrcp.f32 %v703_v4  ;;  %vm786_vm3 = vmor %vm784_vm15, %vm785_vm14  ;;  %v778_v33 = vsel %vm775_vm1, %v777_v25, %v773_v24  ;;  %v804_v46 = vand.u32 2147483648, %v703_v4  ;;  %vm798_vm6 = vweird.f32 %v703_v4 }
 0x2fa   : > { %v781_v15 = vsub.f32 1.0, %v780_v13  ;;  %v963_v38 = vmul.f32 %v1677_v27, %v778_v33  ;;  %v802_v47 = vand.u32 2147483647, %v703_v4 }
 0x2fb   : > { %v805_v53 = vor.u32 1.1754944e-38, %v804_v46 }
 0x2fc   : > { %v782_v18 = vmul.f32 %v1400_v12, %v781_v15  ;;  %vm803_vm9 = vcmp.eq.f32.partialorder %v802_v47, 8.507059e+37 }
 0x2fe   : > { %v783_v26 = vadd.f32 %v1400_v12, %v782_v18 }
 0x2ff   : > { %v1402_v28 = vpop.eup %1401 }
 0x300   : > { %v794_v30 = vmul.f32 %v1402_v28, %v703_v4  ;;  %v706_v31 = vpop.xlane.xlu1 %705  ;;  %v787_v34 = vsel %vm786_vm3, %v1400_v12, %v783_v26  ;;  %vm799_vm5 = vweird.f32 %v1402_v28 }
 0x301   : > { %1403 = vrcp.f32 %v706_v31  ;;  %v792_v36 = vsel %vm789_vm4, %v791_v29, %v787_v34  ;;  %vm800_vm7 = vmor %vm798_vm6, %vm799_vm5  ;;  %v818_v49 = vand.u32 2147483648, %v706_v31  ;;  %v816_v52 = vand.u32 2147483647, %v706_v31 }
 0x302   : > { %v795_v35 = vsub.f32 1.0, %v794_v30  ;;  %v964_v39 = vmul.f32 %v1682_v32, %v792_v36  ;;  %vm812_vm10 = vweird.f32 %v706_v31 }
 0x303   : > { %v819_v54 = vor.u32 1.1754944e-38, %v818_v49  ;;  %vm817_vm12 = vcmp.eq.f32.partialorder %v816_v52, 8.507059e+37 }
 0x304   : > { %v796_v41 = vmul.f32 %v1402_v28, %v795_v35  ;;  %v978_v42 = vpack.c.bf16 %v964_v39, %v963_v38 }
 0x306   : > { %1289 = vmatmul.msk.bf16.gmra.mxu2 %vm592_vm2, %v978_v42  ;;  %v797_v44 = vadd.f32 %v1402_v28, %v796_v41 }
 0x307   : > { %v1404_v43 = vpop.eup %1403 }
 0x308   : > { %v808_v45 = vmul.f32 %v1404_v43, %v706_v31  ;;  %vm813_vm8 = vweird.f32 %v1404_v43  ;;  %v801_v27 = vsel %vm800_vm7, %v1402_v28, %v797_v44 }
 0x309   : > { %vm814_vm11 = vmor %vm812_vm10, %vm813_vm8  ;;  %v806_v56 = vsel %vm803_vm9, %v805_v53, %v801_v27 }
 0x30a   : > { %v809_v48 = vsub.f32 1.0, %v808_v45  ;;  %v965_v62 = vmul.f32 %v1687_v37, %v806_v56 }
 0x30c   : > { %v810_v51 = vmul.f32 %v1404_v43, %v809_v48 }
 0x30e   : > { %v811_v32 = vadd.f32 %v1404_v43, %v810_v51 }
 0x310   : > { %v815_v23 = vsel %vm814_vm11, %v1404_v43, %v811_v32 }
 0x311   : > { %v820_v57 = vsel %vm817_vm12, %v819_v54, %v815_v23 }
 0x312   : > { %v966_v63 = vmul.f32 %v1691_v40, %v820_v57 }
 0x314   : > { %v979_v0 = vpack.c.bf16 %v966_v63, %v965_v62 }
 0x316   : > { %1290 = vmatmul.msk.bf16.gmra.mxu2 %vm592_vm2, %v979_v0 }
 0x328   : > { %v721_v2 = vpop.xlane.xlu2 %720 }
 0x329   : > { %1405 = vrcp.f32 %v721_v2  ;;  %v888_v20 = vand.u32 2147483648, %v721_v2  ;;  %vm882_vm14 = vweird.f32 %v721_v2  ;;  %v886_v18 = vand.u32 2147483647, %v721_v2 }
 0x32b   : > { %v889_v30 = vor.u32 1.1754944e-38, %v888_v20  ;;  %vm887_vm4 = vcmp.eq.f32.partialorder %v886_v18, 8.507059e+37 }
 0x32f   : > { %v1406_v3 = vpop.eup %1405 }
 0x330   : > { %v878_v5 = vmul.f32 %v1406_v3, %v721_v2  ;;  %v1771_v58 = vpop.xlane.xlu2 %708  ;;  %v724_v9 = vpop.xlane.xlu1 %723  ;;  %vm883_vm13 = vweird.f32 %v1406_v3 }
 0x331   : > { %1407 = vrcp.f32 %v1771_v58  ;;  %v900_v59 = vand.u32 2147483647, %v724_v9  ;;  %vm1784_vm15 = vmor %vm882_vm14, %vm883_vm13  ;;  %v902_v25 = vand.u32 2147483648, %v724_v9  ;;  %vm896_vm3 = vweird.f32 %v724_v9 }
 0x332   : > { %v879_v10 = vsub.f32 1.0, %v878_v5  ;;  %1409 = vrcp.f32 %v724_v9  ;;  %vm826_vm5 = vweird.f32 %v1771_v58  ;;  %v830_v45 = vand.u32 2147483647, %v1771_v58 }
 0x333   : > { %vm901_vm7 = vcmp.eq.f32.partialorder %v900_v59, 8.507059e+37  ;;  %v903_v38 = vor.u32 1.1754944e-38, %v902_v25  ;;  %v832_v46 = vand.u32 2147483648, %v1771_v58 }
 0x334   : > { %v880_v11 = vmul.f32 %v1406_v3, %v879_v10  ;;  %vm831_vm13 = vcmp.eq.f32.partialorder %v830_v45, 8.507059e+37 }
 0x336   : > { %v881_v60 = vadd.f32 %v1406_v3, %v880_v11 }
 0x337   : > { %v1774_v12 = vpop.eup %1407 }
 0x338   : > { %v1410_v37 = vpop.eup %1409  ;;  %v822_v40 = vmul.f32 %v1774_v12, %v1771_v58  ;;  %v1778_v13 = vpop.xlane.xlu1 %711  ;;  %v885_v26 = vsel %vm1784_vm15, %v1406_v3, %v881_v60  ;;  %vm827_vm8 = vweird.f32 %v1774_v12 }
 0x339   : > { %v892_v4 = vmul.f32 %v1410_v37, %v724_v9  ;;  %v1780_v14 = vpop.xlane.xlu2 %726  ;;  %1411 = vrcp.f32 %v1778_v13  ;;  %vm897_vm1 = vweird.f32 %v1410_v37  ;;  %v890_v42 = vsel %vm887_vm4, %v889_v30, %v885_v26  ;;  %vm1814_vm10 = vmor %vm826_vm5, %vm827_vm8 }
 0x33a   : > { %v823_v15 = vsub.f32 1.0, %v822_v40  ;;  %1413 = vrcp.f32 %v1780_v14  ;;  %vm1794_vm6 = vmor %vm896_vm3, %vm897_vm1  ;;  %v971_v51 = vmul.f32 %v1698_v50, %v890_v42  ;;  %vm840_vm11 = vweird.f32 %v1778_v13 }
 0x33b   : > { %v893_v17 = vsub.f32 1.0, %v892_v4  ;;  %v844_v53 = vand.u32 2147483647, %v1778_v13  ;;  %v846_v32 = vand.u32 2147483648, %v1778_v13  ;;  %v916_v10 = vand.u32 2147483648, %v1780_v14  ;;  %v1087_v4 = vld [vmem:[%s1872_s14] sm:$0xff] }
 0x33c   : > { %v824_v28 = vmul.f32 %v1774_v12, %v823_v15  ;;  %vm910_vm1 = vweird.f32 %v1780_v14 }
 0x33d   : > { %v894_v24 = vmul.f32 %v1410_v37, %v893_v17  ;;  %v847_v2 = vor.u32 1.1754944e-38, %v846_v32  ;;  %vm845_vm15 = vcmp.eq.f32.partialorder %v844_v53, 8.507059e+37  ;;  %v917_v59 = vor.u32 1.1754944e-38, %v916_v10 }
 0x33e   : > { %v825_v43 = vadd.f32 %v1774_v12, %v824_v28 }
 0x33f   : > { %v1412_v29 = vpop.eup %1411  ;;  %v895_v31 = vadd.f32 %v1410_v37, %v894_v24 }
 0x340   : > { %v1791_v33 = vpop.eup %1413  ;;  %v836_v35 = vmul.f32 %v1412_v29, %v1778_v13  ;;  %v1803_v41 = vpop.xlane.xlu1 %729  ;;  %vm841_vm9 = vweird.f32 %v1412_v29  ;;  %v829_v50 = vsel %vm1814_vm10, %v1774_v12, %v825_v43 }
 0x341   : > { %v899_v36 = vsel %vm1794_vm6, %v1410_v37, %v895_v31  ;;  %v906_v39 = vmul.f32 %v1791_v33, %v1780_v14  ;;  %1415 = vrcp.f32 %v1803_v41  ;;  %vm1825_vm12 = vmor %vm840_vm11, %vm841_vm9  ;;  %vm911_vm14 = vweird.f32 %v1791_v33 }
 0x342   : > { %v837_v44 = vsub.f32 1.0, %v836_v35  ;;  %v904_v48 = vsel %vm901_vm7, %v903_v38, %v899_v36  ;;  %v914_v37 = vand.u32 2147483647, %v1780_v14  ;;  %vm1840_vm3 = vmor %vm910_vm1, %vm911_vm14  ;;  %v930_v15 = vand.u32 2147483648, %v1803_v41 }
 0x343   : > { %v907_v47 = vsub.f32 1.0, %v906_v39  ;;  %v972_v52 = vmul.f32 %v1706_v61, %v904_v48  ;;  %v833_v61 = vor.u32 1.1754944e-38, %v832_v46  ;;  %v928_v20 = vand.u32 2147483647, %v1803_v41 }
 0x344   : > { %v838_v49 = vmul.f32 %v1412_v29, %v837_v44  ;;  %vm915_vm5 = vcmp.eq.f32.partialorder %v914_v37, 8.507059e+37  ;;  %vm924_vm6 = vweird.f32 %v1803_v41  ;;  %v931_v24 = vor.u32 1.1754944e-38, %v930_v15 }
 0x345   : > { %v908_v54 = vmul.f32 %v1791_v33, %v907_v47  ;;  %v982_v23 = vpack.c.bf16 %v972_v52, %v971_v51  ;;  %v834_v58 = vsel %vm831_vm13, %v833_v61, %v829_v50  ;;  %vm929_vm8 = vcmp.eq.f32.partialorder %v928_v20, 8.507059e+37 }
 0x346   : > { %v839_v56 = vadd.f32 %v1412_v29, %v838_v49  ;;  %v967_v40 = vmul.f32 %v1702_v55, %v834_v58 }
 0x347   : > { %v1416_v62 = vpop.eup %1415  ;;  %1293 = vmatmul.msk.bf16.vlgmr.msrb.gmra.mxu3 %vm592_vm2, %v982_v23  ;;  %v909_v9 = vadd.f32 %v1791_v33, %v908_v54 }
 0x348   : > { %v715_v63 = vpop.xlane.xlu2 %714  ;;  %v843_v0 = vsel %vm1825_vm12, %v1412_v29, %v839_v56  ;;  %v920_v3 = vmul.f32 %v1416_v62, %v1803_v41  ;;  %v718_v5 = vpop.xlane.xlu1 %717  ;;  %vm925_vm4 = vweird.f32 %v1416_v62 }
 0x349   : > { %1417 = vrcp.f32 %v715_v63  ;;  %v848_v12 = vsel %vm845_vm15, %v847_v2, %v843_v0  ;;  %v913_v18 = vsel %vm1840_vm3, %v1791_v33, %v909_v9  ;;  %vm926_vm7 = vmor %vm924_vm6, %vm925_vm4  ;;  %v858_v29 = vand.u32 2147483647, %v715_v63 }
 0x34a   : > { %1419 = vrcp.f32 %v718_v5  ;;  %v921_v11 = vsub.f32 1.0, %v920_v3  ;;  %v968_v13 = vmul.f32 %v1713_v6, %v848_v12  ;;  %v918_v26 = vsel %vm915_vm5, %v917_v59, %v913_v18 }
 0x34b   : > { %v860_v31 = vand.u32 2147483648, %v715_v63  ;;  %v874_v34 = vand.u32 2147483648, %v718_v5  ;;  %v973_v38 = vmul.f32 %v1715_v7, %v918_v26  ;;  %v872_v42 = vand.u32 2147483647, %v718_v5 }
 0x34c   : > { %v922_v60 = vmul.f32 %v1416_v62, %v921_v11  ;;  %v980_v17 = vpack.c.bf16 %v968_v13, %v967_v40  ;;  %vm854_vm11 = vweird.f32 %v715_v63  ;;  %vm868_vm13 = vweird.f32 %v718_v5 }
 0x34d   : > { %v861_v45 = vor.u32 1.1754944e-38, %v860_v31  ;;  %vm859_vm14 = vcmp.eq.f32.partialorder %v858_v29, 8.507059e+37  ;;  %v875_v47 = vor.u32 1.1754944e-38, %v874_v34  ;;  %vm873_vm1 = vcmp.eq.f32.partialorder %v872_v42, 8.507059e+37 }
 0x34e   : > { %v923_v55 = vadd.f32 %v1416_v62, %v922_v60  ;;  %1291 = vmatmul.msk.bf16.gmra.mxu2 %vm592_vm2, %v980_v17  ;;  %v1874_v12 = vstv %s1069_s11 }
 0x34f   : > { %v1418_v14 = vpop.eup %1417 }
 0x350   : > { %v1420_v22 = vpop.eup %1419  ;;  %v850_v6 = vmul.f32 %v1418_v14, %v715_v63  ;;  %v927_v30 = vsel %vm926_vm7, %v1416_v62, %v923_v55  ;;  %vm855_vm9 = vweird.f32 %v1418_v14 }
 0x351   : > { %v864_v25 = vmul.f32 %v1420_v22, %v718_v5  ;;  %v932_v35 = vsel %vm929_vm8, %v931_v24, %v927_v30  ;;  %vm869_vm10 = vweird.f32 %v1420_v22  ;;  %vm856_vm12 = vmor %vm854_vm11, %vm855_vm9 }
 0x352   : > { %v851_v28 = vsub.f32 1.0, %v850_v6  ;;  %v974_v39 = vmul.f32 %v1723_v16, %v932_v35  ;;  %vm870_vm15 = vmor %vm868_vm13, %vm869_vm10  ;;  %v733_v16 = vpop.xlane.xlu2 %732  ;;  %v1089_v6 = vld [vmem:[%s1872_s14 + $0x10] sm:$0xff] }
 0x353   : > { %v865_v33 = vsub.f32 1.0, %v864_v25  ;;  %1421 = vrcp.f32 %v733_v16  ;;  %v944_v57 = vand.u32 2147483648, %v733_v16  ;;  %vm938_vm4 = vweird.f32 %v733_v16 }
 0x354   : > { %v852_v36 = vmul.f32 %v1418_v14, %v851_v28  ;;  %v983_v44 = vpack.c.bf16 %v974_v39, %v973_v38  ;;  %v942_v62 = vand.u32 2147483647, %v733_v16  ;;  %v1090_v28 = vld [vmem:[%s1872_s14 + $0x18] sm:$0xff]  ;;  %v1092_v38 = vld [vmem:[%s1872_s14 + $0x28] sm:$0xff] }
 0x355   : > { %v866_v41 = vmul.f32 %v1420_v22, %v865_v33  ;;  %v945_v9 = vor.u32 1.1754944e-38, %v944_v57  ;;  %v1091_v33 = vld [vmem:[%s1872_s14 + $0x20] sm:$0xff] }
 0x356   : > { %v853_v43 = vadd.f32 %v1418_v14, %v852_v36  ;;  %vm943_vm7 = vcmp.eq.f32.partialorder %v942_v62, 8.507059e+37  ;;  %v1100_v62 = vld [vmem:[%s1872_s14 + $0x68] sm:$0xff] }
 0x357   : > { %v867_v46 = vadd.f32 %v1420_v22, %v866_v41  ;;  %1294 = vmatmul.msk.bf16.gmra.mxu3 %vm592_vm2, %v983_v44 }
 0x358   : > { %v857_v7 = vsel %vm856_vm12, %v1418_v14, %v853_v43  ;;  %v1097_v43 = vld [vmem:[%s1872_s14 + $0x50] sm:$0xff] }
 0x359   : > { %v862_v48 = vsel %vm859_vm14, %v861_v45, %v857_v7  ;;  %v871_v49 = vsel %vm870_vm15, %v1420_v22, %v867_v46  ;;  %v1422_v32 = vpop.eup %1421 }
 0x35a   : > { %v876_v51 = vsel %vm873_vm1, %v875_v47, %v871_v49  ;;  %v969_v52 = vmul.f32 %v1735_v21, %v862_v48  ;;  %v934_v54 = vmul.f32 %v1422_v32, %v733_v16  ;;  %vm939_vm3 = vweird.f32 %v1422_v32  ;;  %v1093_v47 = vld [vmem:[%s1872_s14 + $0x30] sm:$0xff]  ;;  %v1098_v16 = vld [vmem:[%s1872_s14 + $0x58] sm:$0xff] }
 0x35b   : > { %v970_v27 = vmul.f32 %v1733_v19, %v876_v51  ;;  %vm1862_vm5 = vmor %vm938_vm4, %vm939_vm3 }
 0x35c   : > { %v935_v56 = vsub.f32 1.0, %v934_v54  ;;  %v1099_v54 = vld [vmem:[%s1872_s14 + $0x60] sm:$0xff] }
 0x35d   : > { %v981_v53 = vpack.c.bf16 %v970_v27, %v969_v52 }
 0x35e   : > { %v936_v50 = vmul.f32 %v1422_v32, %v935_v56 }
 0x35f   : > { %1292 = vmatmul.msk.bf16.gmra.mxu2 %vm592_vm2, %v981_v53  ;;  %v1094_v53 = vld [vmem:[%s1872_s14 + $0x38] sm:$0xff] }
 0x360   : > { %v937_v21 = vadd.f32 %v1422_v32, %v936_v50 }
 0x362   : > { %v941_v3 = vsel %vm1862_vm5, %v1422_v32, %v937_v21 }
 0x363   : > { %v946_v37 = vsel %vm943_vm7, %v945_v9, %v941_v3 }
 0x364   : > { %v975_v20 = vmul.f32 %v1741_v8, %v946_v37  ;;  %v1088_v8 = vld [vmem:[%s1872_s14 + $0x8] sm:$0xff]  ;;  %v1101_v37 = vld [vmem:[%s1872_s14 + $0x70] sm:$0xff] }
 0x368   : > { %v736_v23 = vpop.xlane.xlu1 %735 }
 0x369   : > { %1423 = vrcp.f32 %v736_v23  ;;  %v958_v2 = vand.u32 2147483648, %v736_v23  ;;  %v956_v58 = vand.u32 2147483647, %v736_v23  ;;  %vm952_vm8 = vweird.f32 %v736_v23 }
 0x36b   : > { %v959_v11 = vor.u32 1.1754944e-38, %v958_v2  ;;  %vm957_vm10 = vcmp.eq.f32.partialorder %v956_v58, 8.507059e+37  ;;  %v1096_v58 = vld [vmem:[%s1872_s14 + $0x48] sm:$0xff] }
 0x36f   : > { %v1424_v61 = vpop.eup %1423 }
 0x370   : > { %v948_v19 = vmul.f32 %v1424_v61, %v736_v23  ;;  %vm953_vm6 = vweird.f32 %v1424_v61 }
 0x371   : > { %vm954_vm9 = vmor %vm952_vm8, %vm953_vm6 }
 0x372   : > { %v949_v63 = vsub.f32 1.0, %v948_v19  ;;  %v1095_v19 = vld [vmem:[%s1872_s14 + $0x40] sm:$0xff] }
 0x374   : > { %v950_v5 = vmul.f32 %v1424_v61, %v949_v63 }
 0x376   : > { %v951_v10 = vadd.f32 %v1424_v61, %v950_v5 }
 0x378   : > { %v955_v40 = vsel %vm954_vm9, %v1424_v61, %v951_v10 }
 0x379   : > { %v1029_v13 = vpop.f32.mrf.mxu2  ;;  %v960_v60 = vsel %vm957_vm10, %v959_v11, %v955_v40 }
 0x37a   : > { %v1071_v15 = vmul.f32 %v1874_v12, %v1029_v13  ;;  %v976_v17 = vmul.f32 %v1754_v1, %v960_v60  ;;  %v1102_v60 = vld [vmem:[%s1872_s14 + $0x78] sm:$0xff] }
 0x37c   : > { %v1103_v18 = vadd.f32 %v1087_v4, %v1071_v15  ;;  %v984_v14 = vpack.c.bf16 %v976_v17, %v975_v20 }
 0x37e   : > { %1119 = vst.msk [vmem:[%s1883_s17] sm:$0xff] %vm426_vm0, %v1103_v18  ;;  %1295 = vmatmul.msk.bf16.gmra.mxu3 %vm592_vm2, %v984_v14 }
 0x381   : > { %v1031_v59 = vpop.f32.mrf.mxu2 }
 0x382   : > { %v1072_v1 = vmul.f32 %v1874_v12, %v1031_v59 }
 0x384   : > { %v1104_v55 = vadd.f32 %v1088_v8, %v1072_v1 }
 0x386   : > { %1120 = vst.msk [vmem:[%s1883_s17 + $0x8] sm:$0xff] %vm426_vm0, %v1104_v55 }
 0x389   : > { %v1034_v22 = vpop.f32.mrf.mxu2 }
 0x38a   : > { %v1073_v24 = vmul.f32 %v1874_v12, %v1034_v22 }
 0x38c   : > { %v1105_v25 = vadd.f32 %v1089_v6, %v1073_v24 }
 0x38e   : > { %1121 = vst.msk [vmem:[%s1883_s17 + $0x10] sm:$0xff] %vm426_vm0, %v1105_v25 }
 0x391   : > { %v1036_v26 = vpop.f32.mrf.mxu2 }
 0x392   : > { %v1074_v29 = vmul.f32 %v1874_v12, %v1036_v26 }
 0x394   : > { %v1106_v30 = vadd.f32 %v1090_v28, %v1074_v29 }
 0x396   : > { %1122 = vst.msk [vmem:[%s1883_s17 + $0x18] sm:$0xff] %vm426_vm0, %v1106_v30 }
 0x399   : > { %v1039_v31 = vpop.f32.mrf.mxu2 }
 0x39a   : > { %v1075_v34 = vmul.f32 %v1874_v12, %v1039_v31 }
 0x39c   : > { %v1107_v35 = vadd.f32 %v1091_v33, %v1075_v34 }
 0x39e   : > { %1123 = vst.msk [vmem:[%s1883_s17 + $0x20] sm:$0xff] %vm426_vm0, %v1107_v35 }
 0x3a1   : > { %v1041_v36 = vpop.f32.mrf.mxu2 }
 0x3a2   : > { %v1076_v39 = vmul.f32 %v1874_v12, %v1041_v36 }
 0x3a4   : > { %v1108_v41 = vadd.f32 %v1092_v38, %v1076_v39 }
 0x3a6   : > { %1124 = vst.msk [vmem:[%s1883_s17 + $0x28] sm:$0xff] %vm426_vm0, %v1108_v41 }
 0x3ca   : > { %v1054_v42 = vpop.f32.mrf.mxu3 }
 0x3cb   : > { %v1081_v44 = vmul.f32 %v1874_v12, %v1054_v42 }
 0x3cd   : > { %v1113_v45 = vadd.f32 %v1097_v43, %v1081_v44 }
 0x3cf   : > { %1129 = vst.msk [vmem:[%s1883_s17 + $0x50] sm:$0xff] %vm426_vm0, %v1113_v45 }
 0x3d1   : > { %v1044_v46 = vpop.f32.mrf.mxu2 }
 0x3d2   : > { %v1056_v7 = vpop.f32.mrf.mxu3  ;;  %v1077_v48 = vmul.f32 %v1874_v12, %v1044_v46 }
 0x3d3   : > { %v1082_v49 = vmul.f32 %v1874_v12, %v1056_v7 }
 0x3d4   : > { %v1109_v51 = vadd.f32 %v1093_v47, %v1077_v48 }
 0x3d5   : > { %v1114_v52 = vadd.f32 %v1098_v16, %v1082_v49 }
 0x3d6   : > { %1125 = vst.msk [vmem:[%s1883_s17 + $0x30] sm:$0xff] %vm426_vm0, %v1109_v51 }
 0x3d7   : > { %1130 = vst.msk [vmem:[%s1883_s17 + $0x58] sm:$0xff] %vm426_vm0, %v1114_v52 }
 0x3d9   : > { %v1046_v27 = vpop.f32.mrf.mxu2 }
 0x3da   : > { %v1059_v32 = vpop.f32.mrf.mxu3  ;;  %v1078_v56 = vmul.f32 %v1874_v12, %v1046_v27 }
 0x3db   : > { %v1083_v23 = vmul.f32 %v1874_v12, %v1059_v32 }
 0x3dc   : > { %v1110_v50 = vadd.f32 %v1094_v53, %v1078_v56 }
 0x3dd   : > { %v1115_v61 = vadd.f32 %v1099_v54, %v1083_v23 }
 0x3de   : > { %1126 = vst.msk [vmem:[%s1883_s17 + $0x38] sm:$0xff] %vm426_vm0, %v1110_v50 }
 0x3df   : > { %1131 = vst.msk [vmem:[%s1883_s17 + $0x60] sm:$0xff] %vm426_vm0, %v1115_v61 }
 0x3e2   : > { %v1049_v21 = vpop.f32.mrf.mxu2  ;;  %v1061_v57 = vpop.f32.mrf.mxu3 }
 0x3e3   : > { %v1079_v63 = vmul.f32 %v1874_v12, %v1049_v21  ;;  %v1084_v0 = vmul.f32 %v1874_v12, %v1061_v57 }
 0x3e5   : > { %v1111_v2 = vadd.f32 %v1095_v19, %v1079_v63  ;;  %v1116_v3 = vadd.f32 %v1100_v62, %v1084_v0 }
 0x3e7   : > { %1127 = vst.msk [vmem:[%s1883_s17 + $0x40] sm:$0xff] %vm426_vm0, %v1111_v2 }
 0x3e8   : > { %1132 = vst.msk [vmem:[%s1883_s17 + $0x68] sm:$0xff] %vm426_vm0, %v1116_v3 }
 0x3ea   : > { %v1051_v5 = vpop.f32.mrf.mxu2 }
 0x3eb   : > { %v1080_v9 = vmul.f32 %v1874_v12, %v1051_v5 }
 0x3ed   : > { %v1112_v10 = vadd.f32 %v1096_v58, %v1080_v9 }
 0x3ef   : > { %1128 = vst.msk [vmem:[%s1883_s17 + $0x48] sm:$0xff] %vm426_vm0, %v1112_v10 }
 0x401   : > { %v1064_v11 = vpop.f32.mrf.mxu3 }
 0x402   : > { %v1085_v40 = vmul.f32 %v1874_v12, %v1064_v11 }
 0x404   : > { %v1117_v13 = vadd.f32 %v1101_v37, %v1085_v40 }
 0x406   : > { %1133 = vst.msk [vmem:[%s1883_s17 + $0x70] sm:$0xff] %vm426_vm0, %v1117_v13 }
 0x409   : > { %v1066_v4 = vpop.f32.mrf.mxu3 }
 0x40a   : > { %v1086_v15 = vmul.f32 %v1874_v12, %v1066_v4 }
 0x40c   : > { %v1118_v20 = vadd.f32 %v1102_v60, %v1086_v15 }
 0x40e   : > { %1134 = vst.msk [vmem:[%s1883_s17 + $0x78] sm:$0xff] %vm426_vm0, %v1118_v20 }
 0x40f PF: > { %s18_s9 = sadd.s32 1, %s1479_s9   ;;  %s1993_s26 = smov %s1459_s27 }
 0x410   : > { %p15_p12 = scmp.ge.s32.totalorder %s18_s9, 6   ;;  %s1994_s27 = smov %s1576_s15 }
 0x411   : > { %s1995_s28 = smov %s1471_s30  ;;  %s1996_s29 = smov %s1475_s8 }
 0x412   : > { %s1997_s30 = smov %s2000_s0  ;;  %s1998_s8 = smov %s2004_s10 }
 0x413   :  { %17 = sbr.rel (!%p15_p12) target bundleno = 6 (0x6), region = 126 }

</bundles_post_ra>
